<compile_context>
chip_gen: v7x
topology: tpu7x:2x2x1
jax: 0.10.0
libtpu: 0.0.40
codegen_flags: <defaults>
</compile_context>

<pallas_src>
import jax
import jax.numpy as jnp
from jax import lax
from jax.experimental import pallas as pl
from jax.experimental.pallas import tpu as pltpu


def _fb_dag_conv_kernel(gso_ref, x_ref, w_ref, b_ref, o_ref, sx_ref):
    # gso_ref: (K*N, N)          resident (GSOs stacked along rows)
    # x_ref:   (TM, N, F_in)     current batch block
    # w_ref:   (K, F_in, F_out)  resident
    # b_ref:   (1, F_out)        resident
    # o_ref:   (TM, N, F_out)
    # sx_ref:  (K*TM, N, F_in)   f32 scratch; block (k*TM + m) = GSOs[k] @ X[m]
    K, F_in, F_out = w_ref.shape
    TM, N, _ = x_ref.shape

    # Loop-invariant operands: one VMEM->vreg load each, hoisted.
    gso = gso_ref[...]                                 # (K*N, N)
    w = w_ref[...].astype(jnp.float32)                 # (K, F_in, F_out)
    bias = b_ref[...].astype(jnp.float32)              # (1, F_out)

    # ---- Stage 1: graph shifts.  One MXU matmul per sample covers all K
    # GSOs ((K*N, N) @ (N, F_in)).  Per-k row blocks go straight to the VMEM
    # scratch (sublane-aligned slices, N % 8 == 0) so no long vreg live
    # ranges are carried across the (statically unrolled) sample loop and
    # stage 2 can consume them with m folded into the MXU row dimension.
    for m in range(TM):
        sx_m = jnp.dot(gso, x_ref[m],
                       preferred_element_type=jnp.float32)          # (K*N, F_in)
        for k in range(K):
            sx_ref[k * TM + m] = sx_m[k * N:(k + 1) * N, :]

    # ---- Stage 2: filter bank, batched over the whole block.
    # K matmuls of (TM*N, F_in) @ (F_in, F_out); reduction lives in f32 vregs
    # and the bias is folded into the accumulator init.
    acc = jnp.broadcast_to(bias, (TM * N, F_out))
    for k in range(K):
        lhs = sx_ref[k * TM:(k + 1) * TM].reshape(TM * N, F_in)      # sublane merge
        acc = acc + jnp.dot(lhs, w[k], preferred_element_type=jnp.float32)

    # Single bulk store for the whole batch block.
    o_ref[...] = acc.reshape(TM, N, F_out).astype(o_ref.dtype)


def _pick_tm(M, tm_max=8):
    # Largest divisor of M that is <= tm_max while (when possible) keeping at
    # least 2 grid steps so the "parallel" axis can feed both TCs on v7x.
    divs = [t for t in range(1, min(tm_max, M) + 1) if M % t == 0]
    two_step = [t for t in divs if M // t >= 2]
    return max(two_step) if two_step else max(divs)


def fb_dag_conv_layer(X, GSOs, W, b, *, tm=None):
    """X: (M, N, F_in), GSOs: (K, N, N), W: (K, F_in, F_out), b: (F_out,) or None."""
    M, N, F_in = X.shape
    K = GSOs.shape[0]
    F_out = W.shape[2]

    if tm is None:
        tm = _pick_tm(M)
    else:
        tm = max(1, min(tm, M))
        while M % tm:
            tm -= 1

    gso_stacked = GSOs.reshape(K * N, N)     # contiguous reshape (no transpose)
    if b is None:                            # module supports bias=False
        b = jnp.zeros((F_out,), dtype=X.dtype)
    b2d = b.reshape(1, F_out)

    flops = 2 * M * K * N * (N * F_in + F_in * F_out)
    bytes_accessed = (GSOs.size * GSOs.dtype.itemsize
                      + X.size * X.dtype.itemsize
                      + W.size * W.dtype.itemsize
                      + b2d.size * b2d.dtype.itemsize
                      + M * N * F_out * X.dtype.itemsize)

    return pl.pallas_call(
        _fb_dag_conv_kernel,
        out_shape=jax.ShapeDtypeStruct((M, N, F_out), X.dtype),
        grid_spec=pltpu.PrefetchScalarGridSpec(
            num_scalar_prefetch=0,
            grid=(M // tm,),
            in_specs=[
                # Constant block index => fetched once, VMEM-resident.
                pl.BlockSpec((K * N, N), lambda mi: (0, 0)),            # GSOs
                pl.BlockSpec((tm, N, F_in), lambda mi: (mi, 0, 0)),     # X block
                pl.BlockSpec((K, F_in, F_out), lambda mi: (0, 0, 0)),   # W
                pl.BlockSpec((1, F_out), lambda mi: (0, 0)),            # bias
            ],
            out_specs=pl.BlockSpec((tm, N, F_out), lambda mi: (mi, 0, 0)),
            scratch_shapes=[pltpu.VMEM((K * tm, N, F_in), jnp.float32)],
        ),
        compiler_params=pltpu.CompilerParams(
            dimension_semantics=("parallel",),
            vmem_limit_bytes=32 * 1024 * 1024,
        ),
        cost_estimate=pl.CostEstimate(
            flops=flops, transcendentals=0, bytes_accessed=bytes_accessed),
    )(gso_stacked, X, W, b2d)


def reference(X, GSOs, W, b):
    # Out[m] = sum_k (GSOs[k] @ X[m]) @ W[k] + b
    return jnp.einsum("knp,mpf,kfo->mno", GSOs, X, W,
                      precision=lax.Precision.HIGHEST) + b[None, None, :]


if __name__ == "__main__":
    # Small shapes consistent with the module's forward; M=8 so the batch
    # blocking (tm=4 -> grid of 2 parallel steps) is exercised.
    M, N, F_in, F_out, K = 8, 16, 8, 32, 3

    key = jax.random.PRNGKey(0)
    kx, kg, kw, kb = jax.random.split(key, 4)

    X = jax.random.normal(kx, (M, N, F_in), dtype=jnp.float32)
    GSOs = jax.random.normal(kg, (K, N, N), dtype=jnp.float32)

    # Deterministic xavier_uniform-style W (torch fan_in=F_in*F_out, fan_out=K*F_out).
    fan_in, fan_out = F_in * F_out, K * F_out
    bound = (6.0 / (fan_in + fan_out)) ** 0.5
    W = jax.random.uniform(kw, (K, F_in, F_out), dtype=jnp.float32,
                           minval=-bound, maxval=bound)
    # Module inits b to 0; use a small nonzero bias to exercise the add path.
    b = 0.1 * jax.random.normal(kb, (F_out,), dtype=jnp.float32)

    out = jax.block_until_ready(fb_dag_conv_layer(X, GSOs, W, b))

    ref = reference(X, GSOs, W, b)
    assert out.shape == (M, N, F_out)
    assert jnp.allclose(out, ref, atol=1e-4, rtol=1e-4), "mismatch vs reference"

    print("KERNEL_OK")
</pallas_src>

<mosaic_0001>
module attributes {stable_mosaic.version = 11 : i64} {
  func.func @_fb_dag_conv_kernel(%arg0: i32, %arg1: memref<48x16xf32, #tpu.memory_space<vmem>>, %arg2: memref<4x16x8xf32, #tpu.memory_space<vmem>>, %arg3: memref<3x8x32xf32, #tpu.memory_space<vmem>>, %arg4: memref<1x32xf32, #tpu.memory_space<vmem>>, %arg5: memref<4x16x32xf32, #tpu.memory_space<vmem>>, %arg6: memref<12x16x8xf32, #tpu.memory_space<vmem>>) attributes {dimension_semantics = [#tpu.dimension_semantics<parallel>], iteration_bounds = array<i64: 2>, scalar_prefetch = 0 : i64, scratch_operands = 1 : i64, tpu.core_type = #tpu.core_type<tc>, window_params = [{pipeline_mode = #tpu.pipeline_mode<synchronous>, transform_indices = @transform_0, window_bounds = array<i64: 48, 16>}, {transform_indices = @transform_1, window_bounds = array<i64: 4, 16, 8>}, {pipeline_mode = #tpu.pipeline_mode<synchronous>, transform_indices = @transform_2, window_bounds = array<i64: 3, 8, 32>}, {pipeline_mode = #tpu.pipeline_mode<synchronous>, transform_indices = @transform_3, window_bounds = array<i64: 1, 32>}, {transform_indices = @transform_4, window_bounds = array<i64: 4, 16, 32>}]} {
    %c0 = arith.constant 0 : index
    %c0_0 = arith.constant 0 : index
    %0 = vector.load %arg1[%c0, %c0_0] : memref<48x16xf32, #tpu.memory_space<vmem>>, vector<48x16xf32>
    %c0_1 = arith.constant 0 : index
    %c0_2 = arith.constant 0 : index
    %c0_3 = arith.constant 0 : index
    %1 = vector.load %arg3[%c0_1, %c0_2, %c0_3] : memref<3x8x32xf32, #tpu.memory_space<vmem>>, vector<3x8x32xf32>
    %c0_4 = arith.constant 0 : index
    %c0_5 = arith.constant 0 : index
    %2 = vector.load %arg4[%c0_4, %c0_5] : memref<1x32xf32, #tpu.memory_space<vmem>>, vector<1x32xf32>
    %c0_6 = arith.constant 0 : index
    %c0_7 = arith.constant 0 : index
    %c0_8 = arith.constant 0 : index
    %3 = vector.load %arg2[%c0_6, %c0_7, %c0_8] : memref<4x16x8xf32, #tpu.memory_space<vmem>>, vector<1x16x8xf32>
    %4 = vector.shape_cast %3 : vector<1x16x8xf32> to vector<16x8xf32>
    %cst = arith.constant dense<0.000000e+00> : vector<48x8xf32>
    %5 = tpu.matmul %0, %4, %cst {dimension_numbers = #tpu.dot_dimension_numbers<[1], [0], [0], [1], [0, 0, 1, 1], [], []>} : vector<48x16xf32>, vector<16x8xf32>, vector<48x8xf32> -> vector<48x8xf32>
    %6 = vector.extract_strided_slice %5 {offsets = [0, 0], sizes = [16, 8], strides = [1, 1]} : vector<48x8xf32> to vector<16x8xf32>
    %c0_9 = arith.constant 0 : index
    %c0_10 = arith.constant 0 : index
    %c0_11 = arith.constant 0 : index
    %7 = vector.load %arg6[%c0_9, %c0_10, %c0_11] : memref<12x16x8xf32, #tpu.memory_space<vmem>>, vector<1x16x8xf32>
    %8 = vector.shape_cast %7 : vector<1x16x8xf32> to vector<16x8xf32>
    %9 = vector.shape_cast %6 : vector<16x8xf32> to vector<1x16x8xf32>
    tpu.vector_store %arg6[%c0_9, %c0_10, %c0_11], %9 {strides = array<i32>} : memref<12x16x8xf32, #tpu.memory_space<vmem>>, vector<1x16x8xf32>,
    %10 = vector.extract_strided_slice %5 {offsets = [16, 0], sizes = [16, 8], strides = [1, 1]} : vector<48x8xf32> to vector<16x8xf32>
    %c4 = arith.constant 4 : index
    %c0_12 = arith.constant 0 : index
    %c0_13 = arith.constant 0 : index
    %11 = vector.load %arg6[%c4, %c0_12, %c0_13] : memref<12x16x8xf32, #tpu.memory_space<vmem>>, vector<1x16x8xf32>
    %12 = vector.shape_cast %11 : vector<1x16x8xf32> to vector<16x8xf32>
    %13 = vector.shape_cast %10 : vector<16x8xf32> to vector<1x16x8xf32>
    tpu.vector_store %arg6[%c4, %c0_12, %c0_13], %13 {strides = array<i32>} : memref<12x16x8xf32, #tpu.memory_space<vmem>>, vector<1x16x8xf32>,
    %14 = vector.extract_strided_slice %5 {offsets = [32, 0], sizes = [16, 8], strides = [1, 1]} : vector<48x8xf32> to vector<16x8xf32>
    %c8 = arith.constant 8 : index
    %c0_14 = arith.constant 0 : index
    %c0_15 = arith.constant 0 : index
    %15 = vector.load %arg6[%c8, %c0_14, %c0_15] : memref<12x16x8xf32, #tpu.memory_space<vmem>>, vector<1x16x8xf32>
    %16 = vector.shape_cast %15 : vector<1x16x8xf32> to vector<16x8xf32>
    %17 = vector.shape_cast %14 : vector<16x8xf32> to vector<1x16x8xf32>
    tpu.vector_store %arg6[%c8, %c0_14, %c0_15], %17 {strides = array<i32>} : memref<12x16x8xf32, #tpu.memory_space<vmem>>, vector<1x16x8xf32>,
    %c1 = arith.constant 1 : index
    %c0_16 = arith.constant 0 : index
    %c0_17 = arith.constant 0 : index
    %18 = vector.load %arg2[%c1, %c0_16, %c0_17] : memref<4x16x8xf32, #tpu.memory_space<vmem>>, vector<1x16x8xf32>
    %19 = vector.shape_cast %18 : vector<1x16x8xf32> to vector<16x8xf32>
    %cst_18 = arith.constant dense<0.000000e+00> : vector<48x8xf32>
    %20 = tpu.matmul %0, %19, %cst_18 {dimension_numbers = #tpu.dot_dimension_numbers<[1], [0], [0], [1], [0, 0, 1, 1], [], []>} : vector<48x16xf32>, vector<16x8xf32>, vector<48x8xf32> -> vector<48x8xf32>
    %21 = vector.extract_strided_slice %20 {offsets = [0, 0], sizes = [16, 8], strides = [1, 1]} : vector<48x8xf32> to vector<16x8xf32>
    %c1_19 = arith.constant 1 : index
    %c0_20 = arith.constant 0 : index
    %c0_21 = arith.constant 0 : index
    %22 = vector.load %arg6[%c1_19, %c0_20, %c0_21] : memref<12x16x8xf32, #tpu.memory_space<vmem>>, vector<1x16x8xf32>
    %23 = vector.shape_cast %22 : vector<1x16x8xf32> to vector<16x8xf32>
    %24 = vector.shape_cast %21 : vector<16x8xf32> to vector<1x16x8xf32>
    tpu.vector_store %arg6[%c1_19, %c0_20, %c0_21], %24 {strides = array<i32>} : memref<12x16x8xf32, #tpu.memory_space<vmem>>, vector<1x16x8xf32>,
    %25 = vector.extract_strided_slice %20 {offsets = [16, 0], sizes = [16, 8], strides = [1, 1]} : vector<48x8xf32> to vector<16x8xf32>
    %c5 = arith.constant 5 : index
    %c0_22 = arith.constant 0 : index
    %c0_23 = arith.constant 0 : index
    %26 = vector.load %arg6[%c5, %c0_22, %c0_23] : memref<12x16x8xf32, #tpu.memory_space<vmem>>, vector<1x16x8xf32>
    %27 = vector.shape_cast %26 : vector<1x16x8xf32> to vector<16x8xf32>
    %28 = vector.shape_cast %25 : vector<16x8xf32> to vector<1x16x8xf32>
    tpu.vector_store %arg6[%c5, %c0_22, %c0_23], %28 {strides = array<i32>} : memref<12x16x8xf32, #tpu.memory_space<vmem>>, vector<1x16x8xf32>,
    %29 = vector.extract_strided_slice %20 {offsets = [32, 0], sizes = [16, 8], strides = [1, 1]} : vector<48x8xf32> to vector<16x8xf32>
    %c9 = arith.constant 9 : index
    %c0_24 = arith.constant 0 : index
    %c0_25 = arith.constant 0 : index
    %30 = vector.load %arg6[%c9, %c0_24, %c0_25] : memref<12x16x8xf32, #tpu.memory_space<vmem>>, vector<1x16x8xf32>
    %31 = vector.shape_cast %30 : vector<1x16x8xf32> to vector<16x8xf32>
    %32 = vector.shape_cast %29 : vector<16x8xf32> to vector<1x16x8xf32>
    tpu.vector_store %arg6[%c9, %c0_24, %c0_25], %32 {strides = array<i32>} : memref<12x16x8xf32, #tpu.memory_space<vmem>>, vector<1x16x8xf32>,
    %c2 = arith.constant 2 : index
    %c0_26 = arith.constant 0 : index
    %c0_27 = arith.constant 0 : index
    %33 = vector.load %arg2[%c2, %c0_26, %c0_27] : memref<4x16x8xf32, #tpu.memory_space<vmem>>, vector<1x16x8xf32>
    %34 = vector.shape_cast %33 : vector<1x16x8xf32> to vector<16x8xf32>
    %cst_28 = arith.constant dense<0.000000e+00> : vector<48x8xf32>
    %35 = tpu.matmul %0, %34, %cst_28 {dimension_numbers = #tpu.dot_dimension_numbers<[1], [0], [0], [1], [0, 0, 1, 1], [], []>} : vector<48x16xf32>, vector<16x8xf32>, vector<48x8xf32> -> vector<48x8xf32>
    %36 = vector.extract_strided_slice %35 {offsets = [0, 0], sizes = [16, 8], strides = [1, 1]} : vector<48x8xf32> to vector<16x8xf32>
    %c2_29 = arith.constant 2 : index
    %c0_30 = arith.constant 0 : index
    %c0_31 = arith.constant 0 : index
    %37 = vector.load %arg6[%c2_29, %c0_30, %c0_31] : memref<12x16x8xf32, #tpu.memory_space<vmem>>, vector<1x16x8xf32>
    %38 = vector.shape_cast %37 : vector<1x16x8xf32> to vector<16x8xf32>
    %39 = vector.shape_cast %36 : vector<16x8xf32> to vector<1x16x8xf32>
    tpu.vector_store %arg6[%c2_29, %c0_30, %c0_31], %39 {strides = array<i32>} : memref<12x16x8xf32, #tpu.memory_space<vmem>>, vector<1x16x8xf32>,
    %40 = vector.extract_strided_slice %35 {offsets = [16, 0], sizes = [16, 8], strides = [1, 1]} : vector<48x8xf32> to vector<16x8xf32>
    %c6 = arith.constant 6 : index
    %c0_32 = arith.constant 0 : index
    %c0_33 = arith.constant 0 : index
    %41 = vector.load %arg6[%c6, %c0_32, %c0_33] : memref<12x16x8xf32, #tpu.memory_space<vmem>>, vector<1x16x8xf32>
    %42 = vector.shape_cast %41 : vector<1x16x8xf32> to vector<16x8xf32>
    %43 = vector.shape_cast %40 : vector<16x8xf32> to vector<1x16x8xf32>
    tpu.vector_store %arg6[%c6, %c0_32, %c0_33], %43 {strides = array<i32>} : memref<12x16x8xf32, #tpu.memory_space<vmem>>, vector<1x16x8xf32>,
    %44 = vector.extract_strided_slice %35 {offsets = [32, 0], sizes = [16, 8], strides = [1, 1]} : vector<48x8xf32> to vector<16x8xf32>
    %c10 = arith.constant 10 : index
    %c0_34 = arith.constant 0 : index
    %c0_35 = arith.constant 0 : index
    %45 = vector.load %arg6[%c10, %c0_34, %c0_35] : memref<12x16x8xf32, #tpu.memory_space<vmem>>, vector<1x16x8xf32>
    %46 = vector.shape_cast %45 : vector<1x16x8xf32> to vector<16x8xf32>
    %47 = vector.shape_cast %44 : vector<16x8xf32> to vector<1x16x8xf32>
    tpu.vector_store %arg6[%c10, %c0_34, %c0_35], %47 {strides = array<i32>} : memref<12x16x8xf32, #tpu.memory_space<vmem>>, vector<1x16x8xf32>,
    %c3 = arith.constant 3 : index
    %c0_36 = arith.constant 0 : index
    %c0_37 = arith.constant 0 : index
    %48 = vector.load %arg2[%c3, %c0_36, %c0_37] : memref<4x16x8xf32, #tpu.memory_space<vmem>>, vector<1x16x8xf32>
    %49 = vector.shape_cast %48 : vector<1x16x8xf32> to vector<16x8xf32>
    %cst_38 = arith.constant dense<0.000000e+00> : vector<48x8xf32>
    %50 = tpu.matmul %0, %49, %cst_38 {dimension_numbers = #tpu.dot_dimension_numbers<[1], [0], [0], [1], [0, 0, 1, 1], [], []>} : vector<48x16xf32>, vector<16x8xf32>, vector<48x8xf32> -> vector<48x8xf32>
    %51 = vector.extract_strided_slice %50 {offsets = [0, 0], sizes = [16, 8], strides = [1, 1]} : vector<48x8xf32> to vector<16x8xf32>
    %c3_39 = arith.constant 3 : index
    %c0_40 = arith.constant 0 : index
    %c0_41 = arith.constant 0 : index
    %52 = vector.load %arg6[%c3_39, %c0_40, %c0_41] : memref<12x16x8xf32, #tpu.memory_space<vmem>>, vector<1x16x8xf32>
    %53 = vector.shape_cast %52 : vector<1x16x8xf32> to vector<16x8xf32>
    %54 = vector.shape_cast %51 : vector<16x8xf32> to vector<1x16x8xf32>
    tpu.vector_store %arg6[%c3_39, %c0_40, %c0_41], %54 {strides = array<i32>} : memref<12x16x8xf32, #tpu.memory_space<vmem>>, vector<1x16x8xf32>,
    %55 = vector.extract_strided_slice %50 {offsets = [16, 0], sizes = [16, 8], strides = [1, 1]} : vector<48x8xf32> to vector<16x8xf32>
    %c7 = arith.constant 7 : index
    %c0_42 = arith.constant 0 : index
    %c0_43 = arith.constant 0 : index
    %56 = vector.load %arg6[%c7, %c0_42, %c0_43] : memref<12x16x8xf32, #tpu.memory_space<vmem>>, vector<1x16x8xf32>
    %57 = vector.shape_cast %56 : vector<1x16x8xf32> to vector<16x8xf32>
    %58 = vector.shape_cast %55 : vector<16x8xf32> to vector<1x16x8xf32>
    tpu.vector_store %arg6[%c7, %c0_42, %c0_43], %58 {strides = array<i32>} : memref<12x16x8xf32, #tpu.memory_space<vmem>>, vector<1x16x8xf32>,
    %59 = vector.extract_strided_slice %50 {offsets = [32, 0], sizes = [16, 8], strides = [1, 1]} : vector<48x8xf32> to vector<16x8xf32>
    %c11 = arith.constant 11 : index
    %c0_44 = arith.constant 0 : index
    %c0_45 = arith.constant 0 : index
    %60 = vector.load %arg6[%c11, %c0_44, %c0_45] : memref<12x16x8xf32, #tpu.memory_space<vmem>>, vector<1x16x8xf32>
    %61 = vector.shape_cast %60 : vector<1x16x8xf32> to vector<16x8xf32>
    %62 = vector.shape_cast %59 : vector<16x8xf32> to vector<1x16x8xf32>
    tpu.vector_store %arg6[%c11, %c0_44, %c0_45], %62 {strides = array<i32>} : memref<12x16x8xf32, #tpu.memory_space<vmem>>, vector<1x16x8xf32>,
    %63 = vector.shape_cast %2 : vector<1x32xf32> to vector<1x32xf32>
    %64 = vector.broadcast %63 : vector<1x32xf32> to vector<64x32xf32>
    %c0_46 = arith.constant 0 : index
    %c0_47 = arith.constant 0 : index
    %c0_48 = arith.constant 0 : index
    %65 = vector.load %arg6[%c0_46, %c0_47, %c0_48] : memref<12x16x8xf32, #tpu.memory_space<vmem>>, vector<4x16x8xf32>
    %66 = vector.shape_cast %65 : vector<4x16x8xf32> to vector<64x8xf32>
    %67 = vector.extract_strided_slice %1 {offsets = [0, 0, 0], sizes = [1, 8, 32], strides = [1, 1, 1]} : vector<3x8x32xf32> to vector<1x8x32xf32>
    %68 = vector.shape_cast %67 : vector<1x8x32xf32> to vector<8x32xf32>
    %cst_49 = arith.constant dense<0.000000e+00> : vector<64x32xf32>
    %69 = tpu.matmul %66, %68, %cst_49 {dimension_numbers = #tpu.dot_dimension_numbers<[1], [0], [0], [1], [0, 0, 1, 1], [], []>} : vector<64x8xf32>, vector<8x32xf32>, vector<64x32xf32> -> vector<64x32xf32>
    %70 = arith.addf %64, %69 : vector<64x32xf32>
    %c4_50 = arith.constant 4 : index
    %c0_51 = arith.constant 0 : index
    %c0_52 = arith.constant 0 : index
    %71 = vector.load %arg6[%c4_50, %c0_51, %c0_52] : memref<12x16x8xf32, #tpu.memory_space<vmem>>, vector<4x16x8xf32>
    %72 = vector.shape_cast %71 : vector<4x16x8xf32> to vector<64x8xf32>
    %73 = vector.extract_strided_slice %1 {offsets = [1, 0, 0], sizes = [1, 8, 32], strides = [1, 1, 1]} : vector<3x8x32xf32> to vector<1x8x32xf32>
    %74 = vector.shape_cast %73 : vector<1x8x32xf32> to vector<8x32xf32>
    %cst_53 = arith.constant dense<0.000000e+00> : vector<64x32xf32>
    %75 = tpu.matmul %72, %74, %cst_53 {dimension_numbers = #tpu.dot_dimension_numbers<[1], [0], [0], [1], [0, 0, 1, 1], [], []>} : vector<64x8xf32>, vector<8x32xf32>, vector<64x32xf32> -> vector<64x32xf32>
    %76 = arith.addf %70, %75 : vector<64x32xf32>
    %c8_54 = arith.constant 8 : index
    %c0_55 = arith.constant 0 : index
    %c0_56 = arith.constant 0 : index
    %77 = vector.load %arg6[%c8_54, %c0_55, %c0_56] : memref<12x16x8xf32, #tpu.memory_space<vmem>>, vector<4x16x8xf32>
    %78 = vector.shape_cast %77 : vector<4x16x8xf32> to vector<64x8xf32>
    %79 = vector.extract_strided_slice %1 {offsets = [2, 0, 0], sizes = [1, 8, 32], strides = [1, 1, 1]} : vector<3x8x32xf32> to vector<1x8x32xf32>
    %80 = vector.shape_cast %79 : vector<1x8x32xf32> to vector<8x32xf32>
    %cst_57 = arith.constant dense<0.000000e+00> : vector<64x32xf32>
    %81 = tpu.matmul %78, %80, %cst_57 {dimension_numbers = #tpu.dot_dimension_numbers<[1], [0], [0], [1], [0, 0, 1, 1], [], []>} : vector<64x8xf32>, vector<8x32xf32>, vector<64x32xf32> -> vector<64x32xf32>
    %82 = arith.addf %76, %81 : vector<64x32xf32>
    %83 = vector.shape_cast %82 : vector<64x32xf32> to vector<4x16x32xf32>
    %c0_58 = arith.constant 0 : index
    %c0_59 = arith.constant 0 : index
    %c0_60 = arith.constant 0 : index
    %84 = vector.load %arg5[%c0_58, %c0_59, %c0_60] : memref<4x16x32xf32, #tpu.memory_space<vmem>>, vector<4x16x32xf32>
    tpu.vector_store %arg5[%c0_58, %c0_59, %c0_60], %83 {strides = array<i32>} : memref<4x16x32xf32, #tpu.memory_space<vmem>>, vector<4x16x32xf32>,
    return
  }
  func.func @transform_0(%arg0: i32) -> (i32, i32) {
    %c0_i32 = arith.constant 0 : i32
    %c0_i32_0 = arith.constant 0 : i32
    %c0_i32_1 = arith.constant 0 : i32
    return %c0_i32, %c0_i32_0 : i32, i32
  }
  func.func @transform_1(%arg0: i32) -> (i32, i32, i32) {
    %c0_i32 = arith.constant 0 : i32
    %c0_i32_0 = arith.constant 0 : i32
    %c0_i32_1 = arith.constant 0 : i32
    return %arg0, %c0_i32, %c0_i32_0 : i32, i32, i32
  }
  func.func @transform_2(%arg0: i32) -> (i32, i32, i32) {
    %c0_i32 = arith.constant 0 : i32
    %c0_i32_0 = arith.constant 0 : i32
    %c0_i32_1 = arith.constant 0 : i32
    %c0_i32_2 = arith.constant 0 : i32
    return %c0_i32, %c0_i32_0, %c0_i32_1 : i32, i32, i32
  }
  func.func @transform_3(%arg0: i32) -> (i32, i32) {
    %c0_i32 = arith.constant 0 : i32
    %c0_i32_0 = arith.constant 0 : i32
    %c0_i32_1 = arith.constant 0 : i32
    return %c0_i32, %c0_i32_0 : i32, i32
  }
  func.func @transform_4(%arg0: i32) -> (i32, i32, i32) {
    %c0_i32 = arith.constant 0 : i32
    %c0_i32_0 = arith.constant 0 : i32
    %c0_i32_1 = arith.constant 0 : i32
    return %arg0, %c0_i32, %c0_i32_0 : i32, i32, i32
  }
}

</mosaic_0001>

<bundles_post_ra>
// kernel: tpu_custom_call.1
= control target key start
LH: loop header
LB: loop body
LE: loop exit
PB: predicated region body
PF: predicated region fallthrough
CT: control target
= control target key end

     0   :  { %9 = vsyncpa [#allocation4], 0  ;;  %s1801_s0 = inlined_call_operand.vmem [shape: f32[48,16], index: 0, kind: input, shape index: {}]   ;;  %s1802_s1 = inlined_call_operand.vmem [shape: f32[8,16,8], index: 1, kind: input, shape index: {}]   ;;  %s1803_s2 = inlined_call_operand.vmem [shape: f32[3,8,32], index: 2, kind: input, shape index: {}]   ;;  %s1804_s3 = inlined_call_operand.vmem [shape: f32[1,32], index: 3, kind: input, shape index: {}]   ;;  %s1805_s4 = inlined_call_operand.hbm [shape: f32[8,16,32], index: 4, kind: output, shape index: {}]  }
   0x1   :  { %11 = vsyncpa [#allocation4 + $0x1], 0  ;;  %s1585_s15 = smov 0   ;;  %s1587_s16 = smov 0  }
   0x2   :  { %s1589_s17 = smov 0   ;;  %s1591_s18 = smov 0  }
   0x3 LB: > { %s1606_s19 = sadd.s32 4294967295, %s1555_s18   ;;  %s1185_s20 = sadd.s32 4294967294, %s1555_s18   ;;  %s1555_s18 = sphi %s1591_s18, %s1811_s18   ;;  %s1551_s17 = sphi %s1589_s17, %s1810_s17   ;;  %s1547_s16 = sphi %s1587_s16, %s1809_s16   ;;  %s1543_s15 = sphi %s1585_s15, %s1808_s15  }
   0x4   : > { %s1610_s21 = sadd.s32 1, %s1555_s18   ;;  %s113_s22 = sadd.s32 1, %s1551_s17 }
   0x5   : > { %s110_s23 = ssub.s32 %s1555_s18, %s1610_s21  ;;  %p123_p0 = scmp.ne.s32.totalorder %s1551_s17, %s1547_s16 }
   0x6   : > { %p111_p1 = scmp.eq.s32.totalorder %s110_s23, 0  ;;  %p124_p2 = scmp.eq.s32.totalorder %s1606_s19, 1 }
   0x7   : > { %p129_p3 = scmp.ne.s32.totalorder %s1547_s16, %s1543_s15  ;;  %p130_p4 = scmp.eq.s32.totalorder %s1185_s20, 1 }
   0x8   : > { %s1621_s24 = scalar_select %p111_p1, %s1551_s17, %s113_s22  }
   0x9   : > { %p1623_p5 = por %p124_p2, %p123_p0  ;;  %p1627_p6 = por %p130_p4, %p129_p3 }
   0xa   : > { %p1188_p7 = scmp.ge.s32.totalorder %s1555_s18, 1  ;;  %p167_p8 = scmp.lt.s32.totalorder %s1555_s18, 3 }
   0xc   : > { %p168_p9 = pnand %p1188_p7, %p167_p8 }
   0xd   : > { %s1190_s27 = sshll.u32 (!%p168_p9), %s1606_s19, 2  ;;  %v204_v0 = vld [vmem:[%s1801_s0 + $0x10] sm:$0xff] (!%p168_p9)  ;;  %vm214_vm0 = vcmask (!%p168_p9), 130048   ;;  %v202_v1 = vld [vmem:[%s1801_s0] sm:$0xff] (!%p168_p9)  ;;  %v205_v13 = vld [vmem:[%s1801_s0 + $0x18] sm:$0xff] (!%p168_p9)  ;;  %vm328_vm1 = vcmask (!%p168_p9), 64512  }
   0xe   : > { %171 = sbr.rel (%p168_p9) target bundleno = 523 (0x20b), region = 36  ;;  %p195_p10 = scmp.lt.s32.totalorder (!%p168_p9), %s1190_s27, 7  ;;  %1323 = vmatprep.mubr.msk.f32.mxu1 (!%p168_p9), %vm214_vm0, %v204_v0  ;;  %1320 = vmatprep.mubr.msk.f32.mxu0 (!%p168_p9), %vm214_vm0, %v202_v1  ;;  %v203_v14 = vld [vmem:[%s1801_s0 + $0x8] sm:$0xff] (!%p168_p9)  ;;  %v206_v15 = vld [vmem:[%s1801_s0 + $0x20] sm:$0xff] (!%p168_p9)  ;;  %v210_v20 = vld [vmem:[%s1803_s2 + $0x10] sm:$0xff] (!%p168_p9)  ;;  %vm1099_vm2 = vcmask (!%p168_p9), 261120  }
   0xf   : > { %v207_v17 = vld [vmem:[%s1801_s0 + $0x28] sm:$0xff] (!%p168_p9)  ;;  %v208_v19 = vld [vmem:[%s1803_s2] sm:$0xff] (!%p168_p9)  ;;  %s191_s7 = sand.u32 (!%p168_p9), 1, %s1547_s16   ;;  %s1256_s12 = sshll.u32 (!%p168_p9), %s1606_s19, 10 }
  0x10   : > { %v209_v18 = vld [vmem:[%s1803_s2 + $0x8] sm:$0xff] (!%p168_p9)  ;;  %s1189_s8 = sshll.u32 (!%p168_p9), %s191_s7, 6  ;;  %s1752_s22 = scalar_lea.hbm (!%p168_p9), %s1805_s4, %s1256_s12 }
  0x11   : > { %s193_s11 = scalar_lea.vmem (!%p168_p9), [#allocation3], %s1189_s8  ;;  %s1760_s19 = scalar_lea.sflag (!%p168_p9), [#allocation4], %s191_s7 }
  0x12   : > { %s1123_s13 = sshll.u32 (!%p168_p9), %s193_s11, 4  ;;  %s1754_s13 = int_to_ptr.vmem [resolvable:$true] %s1123_s13 }
  0x13   : > { %s1493_s23 = scalar_lea.vmem (!%p168_p9), %s1754_s13, 1024 }
  0x14   : > { %p1494_p11 = scmp.ne.s32.totalorder (!%p168_p9), %s1754_s13, %s1493_s23 }
  0x15   : > { %s1813_s27 = smov (!%p195_p10, %s1190_s27), 7 }
  0x16   : > { %s1254_s6 = sshll.u32 %s1813_s27, 4  ;;  %p1495_p12 = pnand %p1494_p11, %p1623_p5 }
  0x17   : > { %s199_s9 = scalar_lea.vmem %s1802_s1, %s1254_s6  ;;  %s1557_s27 = smov [#allocation3]  }
  0x18   : > { %v212_v2 = vld [vmem:[%s199_s9] sm:$0xff]  ;;  %v213_v3 = vld [vmem:[%s199_s9 + $0x8] sm:$0xff]  ;;  %v1199_v4 = vld [vmem:[%s199_s9 + $0x10] sm:$0xff]  ;;  %p1496_p13 = pneg %p1495_p12  ;;  %s1497_s28 = sshll.u32 %s1557_s27, 4  ;;  %s1498_s28 = int_to_ptr.vmem [resolvable:$false] %s1497_s28 }
  0x19   : > { %v1410_v5 = vpack.c.bf16 %v213_v3, %v212_v2  ;;  %v1200_v6 = vld [vmem:[%s199_s9 + $0x18] sm:$0xff]  ;;  %v1215_v7 = vld [vmem:[%s199_s9 + $0x30] sm:$0xff]  ;;  %v1207_v10 = vld [vmem:[%s199_s9 + $0x20] sm:$0xff]  ;;  %s1499_s29 = scalar_lea.vmem %s1498_s28, 2048  ;;  %p1500_p0 = scmp.lt.s32.totalorder %s1754_s13, %s1498_s28 }
  0x1a   : > { %v1414_v8 = vpack.c.bf16 %v1200_v6, %v1199_v4  ;;  %v1216_v9 = vld [vmem:[%s199_s9 + $0x38] sm:$0xff]  ;;  %v1208_v11 = vld [vmem:[%s199_s9 + $0x28] sm:$0xff]  ;;  %p1501_p1 = scmp.lt.s32.totalorder %s1499_s29, %s1493_s23 }
  0x1b   : > { %1426 = vmatprep.subr.bf16.mxu1 %v1410_v5  ;;  %1411 = vmatprep.subr.bf16.mxu0 %v1410_v5  ;;  %v1418_v12 = vpack.c.bf16 %v1208_v11, %v1207_v10  ;;  %v1422_v16 = vpack.c.bf16 %v1216_v9, %v1215_v7 }
  0x1c   : > { %1427 = vmatpush3.bf16.msra.mxu1 %v1410_v5  ;;  %1413 = vmatpush3.bf16.msra.mxu0 %v1410_v5  ;;  %p1502_p2 = por %p1501_p1, %p1500_p0 }
  0x1d   : > { %1415 = vmatprep.subr.bf16.mxu1 %v1414_v8  ;;  %1419 = vmatprep.subr.bf16.mxu0 %v1418_v12 }
  0x1e   : > { %p1503_p3 = pnand %p1502_p2, %p1496_p13 }
  0x1f   : > { %1324 = vmatmul.mubr.msk.f32.vlgmr.msra.gmra.mrb[0].mxu1 %vm214_vm0, %v205_v13  ;;  %1321 = vmatmul.mubr.msk.f32.vlgmr.msra.gmra.mrb[0].mxu0 %vm214_vm0, %v203_v14 }
  0x20   : > { %1417 = vmatpush3.bf16.msra.mxu1 %v1414_v8  ;;  %1326 = vmatprep.mubr.msk.f32.mxu1 %vm214_vm0, %v206_v15 }
  0x21   : > { %1423 = vmatprep.subr.bf16.mxu1 %v1422_v16  ;;  %1421 = vmatpush3.bf16.msra.mxu0 %v1418_v12 }
  0x22   : > { %1346 = vmatprep.mubr.msk.f32.mxu0 %vm214_vm0, %v202_v1  ;;  %1382 = vmatprep.subr.mxu0 %v209_v18 }
  0x23   : > { %1327 = vmatmul.mubr.msk.f32.gmra.mrb[2].mxu1 %vm214_vm0, %v207_v17 }
  0x24   : > { %1333 = vmatprep.mubr.msk.f32.mxu1 %vm214_vm0, %v202_v1  ;;  %1347 = vmatmul.mubr.msk.f32.vlgmr.msra.gmra.mrb[2].mxu0 %vm214_vm0, %v203_v14 }
  0x25   : > { %1349 = vmatprep.mubr.msk.f32.mxu0 %vm214_vm0, %v204_v0  ;;  %1383 = vmatpush3.msra.mxu0 %v209_v18 }
  0x26   : > { %1396 = vmatprep.subr.mxu0 %v210_v20 }
  0x27   : > { %1334 = vmatmul.mubr.msk.f32.vlgmr.msra.gmra.mrb[4].mxu1 %vm214_vm0, %v203_v14 }
  0x28   : > { %1425 = vmatpush3.bf16.msra.mxu1 %v1422_v16  ;;  %1336 = vmatprep.mubr.msk.f32.mxu1 %vm214_vm0, %v204_v0 }
  0x29   : > { %1350 = vmatmul.mubr.msk.f32.gmra.mrb[4].mxu0 %vm214_vm0, %v205_v13  ;;  %1368 = vmatprep.subr.mxu1 %v208_v19 }
  0x2a   : > { %1352 = vmatprep.mubr.msk.f32.mxu0 %vm214_vm0, %v206_v15 }
  0x2b   : > { %1337 = vmatmul.mubr.msk.f32.gmra.mrb[6].mxu1 %vm214_vm0, %v205_v13 }
  0x2c   : > { %1339 = vmatprep.mubr.msk.f32.mxu1 %vm214_vm0, %v206_v15 }
  0x2d   : > { %1353 = vmatmul.mubr.msk.f32.gmra.mrb[6].mxu0 %vm214_vm0, %v207_v17 }
  0x2f   : > { %1340 = vmatmul.mubr.msk.f32.gmra.mrb[8].mxu1 %vm214_vm0, %v207_v17 }
  0x30   : > { %1359 = vmatprep.mubr.msk.f32.mxu1 %vm214_vm0, %v202_v1 }
  0x33   : > { %1360 = vmatmul.mubr.msk.f32.vlgmr.msra.gmra.mrb[10].mxu1 %vm214_vm0, %v203_v14 }
  0x34   : > { %1362 = vmatprep.mubr.msk.f32.mxu1 %vm214_vm0, %v204_v0  ;;  %1369 = vmatpush3.msra.mxu1 %v208_v19 }
  0x37   : > { %1363 = vmatmul.mubr.msk.f32.gmra.mrb[12].mxu1 %vm214_vm0, %v205_v13  ;;  %v1223_v13 = vld [vmem:[%s1804_s3] ss:$0 sm:$0xff] }
  0x38   : > { %1365 = vmatprep.mubr.msk.f32.mxu1 %vm214_vm0, %v206_v15 }
  0x3b   : > { %1366 = vmatmul.mubr.msk.f32.gmra.mrb[14].mxu1 %vm214_vm0, %v207_v17 }
  0xf2   : > { %v1325_v21 = vpop.f32.mrb[0].mxu1  ;;  %v1322_v22 = vpop.f32.mrb[0].mxu0 }
  0xf3   : > { %333 = vst.msk [vmem:[#allocation2 + $0x48] sm:$0xff] %vm328_vm1, %v1325_v21  ;;  %v309_v23 = vpop.f32.mrb[1].mxu1  ;;  %330 = vst.msk [vmem:[#allocation2 + $0x8] sm:$0xff] %vm328_vm1, %v1322_v22  ;;  %v299_v24 = vpop.f32.mrb[1].mxu0 }
  0xf4   : > { %332 = vst.msk [vmem:[#allocation2 + $0x40] sm:$0xff] %vm328_vm1, %v309_v23  ;;  %329 = vst.msk [vmem:[#allocation2] sm:$0xff] %vm328_vm1, %v299_v24 }
  0xf6   : > { %v1328_v25 = vpop.f32.mrb[2].mxu1 }
  0xf7   : > { %336 = vst.msk [vmem:[#allocation2 + $0x88] sm:$0xff] %vm328_vm1, %v1328_v25  ;;  %v319_v26 = vpop.f32.mrb[3].mxu1  ;;  %v1348_v27 = vpop.f32.mrb[2].mxu0 }
  0xf8   : > { %335 = vst.msk [vmem:[#allocation2 + $0x80] sm:$0xff] %vm328_vm1, %v319_v26  ;;  %544 = vst.msk [vmem:[#allocation2 + $0x28] sm:$0xff] %vm328_vm1, %v1348_v27  ;;  %v513_v28 = vpop.f32.mrb[3].mxu0 }
  0xf9   : > { %543 = vst.msk [vmem:[#allocation2 + $0x20] sm:$0xff] %vm328_vm1, %v513_v28 }
  0xfa   : > { %v1335_v29 = vpop.f32.mrb[4].mxu1  ;;  %v665_v30 = vld [vmem:[#allocation2 + $0x8] sm:$0xff] }
  0xfb   : > { %437 = vst.msk [vmem:[#allocation2 + $0x18] sm:$0xff] %vm328_vm1, %v1335_v29  ;;  %v406_v31 = vpop.f32.mrb[5].mxu1  ;;  %v809_v32 = vld [vmem:[#allocation2 + $0x40] sm:$0xff]  ;;  %v810_v34 = vld [vmem:[#allocation2 + $0x48] sm:$0xff] }
  0xfc   : > { %v664_v33 = vld [vmem:[#allocation2] sm:$0xff]  ;;  %436 = vst.msk [vmem:[#allocation2 + $0x10] sm:$0xff] %vm328_vm1, %v406_v31  ;;  %1384 = vmatprep.mubr.msk.f32.mxu0 %vm328_vm1, %v809_v32  ;;  %v1351_v35 = vpop.f32.mrb[4].mxu0 }
  0xfd   : > { %1370 = vmatprep.mubr.msk.f32.mxu1 %vm328_vm1, %v664_v33  ;;  %1385 = vmatmul.mubr.msk.f32.vlgmr.msra.gmra.mrb[8].mxu0 %vm328_vm1, %v810_v34  ;;  %547 = vst.msk [vmem:[#allocation2 + $0x68] sm:$0xff] %vm328_vm1, %v1351_v35  ;;  %v523_v36 = vpop.f32.mrb[5].mxu0 }
  0xfe   : > { %1371 = vmatmul.mubr.msk.f32.vlgmr.msra.gmra.mrb[16].mxu1 %vm328_vm1, %v665_v30  ;;  %v1338_v37 = vpop.f32.mrb[6].mxu1  ;;  %546 = vst.msk [vmem:[#allocation2 + $0x60] sm:$0xff] %vm328_vm1, %v523_v36  ;;  %1397 = vmatpush3.msra.mxu0 %v210_v20  ;;  %v955_v62 = vld [vmem:[#allocation2 + $0x88] sm:$0xff] }
  0xff   : > { %440 = vst.msk [vmem:[#allocation2 + $0x58] sm:$0xff] %vm328_vm1, %v1338_v37  ;;  %v416_v38 = vpop.f32.mrb[7].mxu1  ;;  %v669_v47 = vld [vmem:[#allocation2 + $0x28] sm:$0xff]  ;;  %v954_v61 = vld [vmem:[#allocation2 + $0x80] sm:$0xff] }
 0x100   : > { %439 = vst.msk [vmem:[#allocation2 + $0x50] sm:$0xff] %vm328_vm1, %v416_v38  ;;  %v1354_v39 = vpop.f32.mrb[6].mxu0  ;;  %v668_v44 = vld [vmem:[#allocation2 + $0x20] sm:$0xff] }
 0x101   : > { %550 = vst.msk [vmem:[#allocation2 + $0xa8] sm:$0xff] %vm328_vm1, %v1354_v39  ;;  %v533_v40 = vpop.f32.mrb[7].mxu0 }
 0x102   : > { %v1341_v41 = vpop.f32.mrb[8].mxu1  ;;  %549 = vst.msk [vmem:[#allocation2 + $0xa0] sm:$0xff] %vm328_vm1, %v533_v40  ;;  %v667_v45 = vld [vmem:[#allocation2 + $0x18] sm:$0xff] }
 0x103   : > { %443 = vst.msk [vmem:[#allocation2 + $0x98] sm:$0xff] %vm328_vm1, %v1341_v41  ;;  %v426_v42 = vpop.f32.mrb[9].mxu1  ;;  %v666_v43 = vld [vmem:[#allocation2 + $0x10] sm:$0xff] }
 0x104   : > { %442 = vst.msk [vmem:[#allocation2 + $0x90] sm:$0xff] %vm328_vm1, %v426_v42  ;;  %1373 = vmatprep.mubr.msk.f32.mxu1 %vm328_vm1, %v666_v43  ;;  %v814_v53 = vld [vmem:[#allocation2 + $0x68] sm:$0xff] }
 0x105   : > { %1374 = vmatmul.mubr.msk.f32.gmra.mrb[18].mxu1 %vm328_vm1, %v667_v45  ;;  %v813_v50 = vld [vmem:[#allocation2 + $0x60] sm:$0xff] }
 0x106   : > { %v1361_v46 = vpop.f32.mrb[10].mxu1  ;;  %1376 = vmatprep.mubr.msk.f32.mxu1 %vm328_vm1, %v668_v44  ;;  %v812_v51 = vld [vmem:[#allocation2 + $0x58] sm:$0xff] }
 0x107   : > { %651 = vst.msk [vmem:[#allocation2 + $0x38] sm:$0xff] %vm328_vm1, %v1361_v46  ;;  %v620_v48 = vpop.f32.mrb[11].mxu1  ;;  %v811_v49 = vld [vmem:[#allocation2 + $0x50] sm:$0xff] }
 0x108   : > { %650 = vst.msk [vmem:[#allocation2 + $0x30] sm:$0xff] %vm328_vm1, %v620_v48  ;;  %1387 = vmatprep.mubr.msk.f32.mxu0 %vm328_vm1, %v811_v49  ;;  %v959_v3 = vld [vmem:[#allocation2 + $0xa8] sm:$0xff] }
 0x109   : > { %1388 = vmatmul.mubr.msk.f32.gmra.mrb[10].mxu0 %vm328_vm1, %v812_v51  ;;  %1377 = vmatmul.mubr.msk.f32.gmra.mrb[20].mxu1 %vm328_vm1, %v669_v47  ;;  %v958_v0 = vld [vmem:[#allocation2 + $0xa0] sm:$0xff] }
 0x10a   : > { %v1364_v52 = vpop.f32.mrb[12].mxu1  ;;  %1390 = vmatprep.mubr.msk.f32.mxu0 %vm328_vm1, %v813_v50  ;;  %v957_v1 = vld [vmem:[#allocation2 + $0x98] sm:$0xff] }
 0x10b   : > { %654 = vst.msk [vmem:[#allocation2 + $0x78] sm:$0xff] %vm328_vm1, %v1364_v52  ;;  %v630_v54 = vpop.f32.mrb[13].mxu1  ;;  %v956_v63 = vld [vmem:[#allocation2 + $0x90] sm:$0xff] }
 0x10c   : > { %653 = vst.msk [vmem:[#allocation2 + $0x70] sm:$0xff] %vm328_vm1, %v630_v54 }
 0x10d   : > { %1391 = vmatmul.mubr.msk.f32.gmra.mrb[12].mxu0 %vm328_vm1, %v814_v53 }
 0x10e   : > { %v1367_v55 = vpop.f32.mrb[14].mxu1  ;;  %v671_v58 = vld [vmem:[#allocation2 + $0x38] sm:$0xff] }
 0x10f   : > { %v670_v56 = vld [vmem:[#allocation2 + $0x30] sm:$0xff]  ;;  %657 = vst.msk [vmem:[#allocation2 + $0xb8] sm:$0xff] %vm328_vm1, %v1367_v55  ;;  %v640_v57 = vpop.f32.mrb[15].mxu1 }
 0x110   : > { %1379 = vmatprep.mubr.msk.f32.mxu1 %vm328_vm1, %v670_v56  ;;  %656 = vst.msk [vmem:[#allocation2 + $0xb0] sm:$0xff] %vm328_vm1, %v640_v57 }
 0x111   : > { %1380 = vmatmul.mubr.msk.f32.gmra.mrb[22].mxu1 %vm328_vm1, %v671_v58 }
 0x112   : > { %v816_v60 = vld [vmem:[#allocation2 + $0x78] sm:$0xff] }
 0x113   : > { %v815_v59 = vld [vmem:[#allocation2 + $0x70] sm:$0xff] }
 0x114   : > { %1393 = vmatprep.mubr.msk.f32.mxu0 %vm328_vm1, %v815_v59 }
 0x115   : > { %1394 = vmatmul.mubr.msk.f32.gmra.mrb[14].mxu0 %vm328_vm1, %v816_v60 }
 0x116   : > { %1398 = vmatprep.mubr.msk.f32.mxu0 %vm328_vm1, %v954_v61  ;;  %v961_v4 = vld [vmem:[#allocation2 + $0xb8] sm:$0xff] }
 0x117   : > { %v960_v2 = vld [vmem:[#allocation2 + $0xb0] sm:$0xff] }
 0x119   : > { %1399 = vmatmul.mubr.msk.f32.vlgmr.msra.gmra.mrb[8].mxu0 %vm328_vm1, %v955_v62 }
 0x11a   : > { %1401 = vmatprep.mubr.msk.f32.mxu0 %vm328_vm1, %v956_v63 }
 0x11d   : > { %1402 = vmatmul.mubr.msk.f32.gmra.mrb[10].mxu0 %vm328_vm1, %v957_v1 }
 0x11e   : > { %1404 = vmatprep.mubr.msk.f32.mxu0 %vm328_vm1, %v958_v0 }
 0x121   : > { %1405 = vmatmul.mubr.msk.f32.gmra.mrb[12].mxu0 %vm328_vm1, %v959_v3 }
 0x122   : > { %1407 = vmatprep.mubr.msk.f32.mxu0 %vm328_vm1, %v960_v2 }
 0x125   : > { %1408 = vmatmul.mubr.msk.f32.gmra.mrb[14].mxu0 %vm328_vm1, %v961_v4 }
 0x1d1   : > { %v1372_v5 = vpop.f32.mrb[16].mxu1 }
 0x1d2   : > { %v762_v6 = vpop.f32.mrb[17].mxu1  ;;  %v802_v14 = vadd.f32 %v1372_v5, %v1223_v13 }
 0x1d3   : > { %v801_v15 = vadd.f32 %v1223_v13, %v762_v6 }
 0x1d8   : > { %v1375_v7 = vpop.f32.mrb[18].mxu1 }
 0x1d9   : > { %v772_v8 = vpop.f32.mrb[19].mxu1  ;;  %v804_v20 = vadd.f32 %v1375_v7, %v1223_v13 }
 0x1da   : > { %v803_v21 = vadd.f32 %v1223_v13, %v772_v8 }
 0x1dc   : > { %v1378_v9 = vpop.f32.mrb[20].mxu1 }
 0x1dd   : > { %v782_v10 = vpop.f32.mrb[21].mxu1  ;;  %v806_v26 = vadd.f32 %v1378_v9, %v1223_v13 }
 0x1de   : > { %v805_v27 = vadd.f32 %v1223_v13, %v782_v10 }
 0x1e4   : > { %v1381_v11 = vpop.f32.mrb[22].mxu1 }
 0x1e5   : > { %v792_v12 = vpop.f32.mrb[23].mxu1  ;;  %v808_v32 = vadd.f32 %v1381_v11, %v1223_v13 }
 0x1e6   : > { %v807_v33 = vadd.f32 %v1223_v13, %v792_v12 }
 0x1ec   : > { %v1400_v16 = vpop.f32.mrb[8].mxu0 }
 0x1ed   : > { %v1429_v17 = vadd.f32 %v1400_v16, %v802_v14  ;;  %v1052_v18 = vpop.f32.mrb[9].mxu0 }
 0x1ee   : > { %v1431_v19 = vadd.f32 %v1052_v18, %v801_v15 }
 0x1ef   : > { %1101 = vst.msk [vmem:[%s193_s11 + $0x8] sm:$0xff] %vm1099_vm2, %v1429_v17 }
 0x1f0   : > { %1100 = vst.msk [vmem:[%s193_s11] sm:$0xff] %vm1099_vm2, %v1431_v19  ;;  %v1403_v22 = vpop.f32.mrb[10].mxu0 }
 0x1f1   : > { %v1433_v23 = vadd.f32 %v1403_v22, %v804_v20  ;;  %v1062_v24 = vpop.f32.mrb[11].mxu0 }
 0x1f2   : > { %v1435_v25 = vadd.f32 %v1062_v24, %v803_v21 }
 0x1f3   : > { %1103 = vst.msk [vmem:[%s193_s11 + $0x18] sm:$0xff] %vm1099_vm2, %v1433_v23 }
 0x1f4   : > { %1102 = vst.msk [vmem:[%s193_s11 + $0x10] sm:$0xff] %vm1099_vm2, %v1435_v25  ;;  %v1406_v28 = vpop.f32.mrb[12].mxu0 }
 0x1f5   : > { %v1437_v29 = vadd.f32 %v1406_v28, %v806_v26  ;;  %v1072_v30 = vpop.f32.mrb[13].mxu0 }
 0x1f6   : > { %v1439_v31 = vadd.f32 %v1072_v30, %v805_v27 }
 0x1f7   : > { %1105 = vst.msk [vmem:[%s193_s11 + $0x28] sm:$0xff] %vm1099_vm2, %v1437_v29 }
 0x1f8   : > { %1104 = vst.msk [vmem:[%s193_s11 + $0x20] sm:$0xff] %vm1099_vm2, %v1439_v31  ;;  %v1409_v34 = vpop.f32.mrb[14].mxu0 }
 0x1f9   : > { %v1441_v35 = vadd.f32 %v1409_v34, %v808_v32  ;;  %v1082_v36 = vpop.f32.mrb[15].mxu0 }
 0x1fa   : > { %v1443_v37 = vadd.f32 %v1082_v36, %v807_v33 }
 0x1fb   : > { %1107 = vst.msk [vmem:[%s193_s11 + $0x38] sm:$0xff] %vm1099_vm2, %v1441_v35 }
 0x1fc   : > { %1106 = vst.msk [vmem:[%s193_s11 + $0x30] sm:$0xff] %vm1099_vm2, %v1443_v37 }
 0x1fd   : > { %1506 = shalt.err (!%p1503_p3)
}
 0x1fe   : > { %s1507_s30 = scalar_lea.hbm %s1752_s22, 1024  ;;  %s1511_s7 = scalar_lea.hbm %s1805_s4, 2048 }
 0x1ff   : > { %p1508_p4 = scmp.ne.s32.totalorder %s1752_s22, %s1507_s30  ;;  %p1512_p9 = scmp.lt.u32.totalorder %s1752_s22, %s1805_s4 }
 0x200   : > { %p1513_p10 = scmp.lt.u32.totalorder %s1511_s7, %s1507_s30  ;;  %p1515_p12 = scmp.lt.u32.totalorder %s1507_s30, %s1752_s22 }
 0x201   : > { %p1509_p7 = pnand %p1508_p4, %p1623_p5 }
 0x202   : > { %p1514_p11 = por %p1513_p10, %p1512_p9 }
 0x203   : > { %p1510_p8 = pneg %p1509_p7 }
 0x204   : > { %p1516_p13 = por %p1515_p12, %p1514_p11 }
 0x206   : > { %p1517_p0 = pnand %p1516_p13, %p1510_p8 }
 0x208   : > { %1520 = shalt.err (!%p1517_p0)
}
 0x209   : > { %s1558_s10 = smov 128   ;;  %s1559_s11 = smov 8  }
 0x20a   : > { %1452 = dma.vmem_to_hbm [thread:$0]  (%p1623_p5), %s1754_s13, 1024, %s1752_s22, %s1760_s19, %s1558_s10, %s1558_s10, %s1559_s11  }
 0x20b PF: > { %p1458_p1 = scmp.ge.s32.totalorder %s1555_s18, 2  ;;  %s1138_s12 = sand.u32 1, %s1543_s15  }
 0x20c   : > { %s1139_s14 = scalar_lea.sflag [#allocation4], %s1138_s12 }
 0x20d   : > { %p1455_p2 = pnand %p1458_p1, %p1627_p6 }
 0x20f   : > { %1538 = dma.done.wait (!%p1455_p2), %s1139_s14, 1024  }
 0x210   : > { %1540 = vsyncadd (!%p1455_p2), %s1139_s14, 4294966272  ;;  %p14_p3 = scmp.ge.s32.totalorder %s1610_s21, 4   ;;  %s1808_s15 = smov %s1547_s16 }
 0x211   : > { %s1809_s16 = smov %s1551_s17  ;;  %s1810_s17 = smov %s1621_s24 }
 0x212   : > { %s1811_s18 = smov %s1610_s21  ;;  %16 = sbr.rel (!%p14_p3) target bundleno = 3 (0x3), region = 85 }
 0x219   :  { %1144 = vsyncpa [#allocation4], 1 }
 0x21a   :  { %1146 = vsyncpa [#allocation4 + $0x1], 1 }

</bundles_post_ra>
